<compile_context>
chip_gen: v5e
topology: v5e:2x2
jax: 0.10.0
libtpu: 0.0.40
codegen_flags: <defaults>
</compile_context>

<pallas_src>
import jax
import jax.numpy as jnp
from jax import lax
from jax.experimental import pallas as pl
from jax.experimental.pallas import tpu as pltpu


NEG_SLOPE = 0.01  # F.leaky_relu default negative slope


def _mlp_kernel(x_ref, w_ref, b_ref, wout_ref, bout_ref, o_ref):
    """Single-invocation 21-layer MLP.

    x_ref:    (B, H)      input states
    w_ref:    (L, H, H)   stacked hidden weights (pre-transposed to in x out)
    b_ref:    (L, 1, H)   stacked hidden biases
    wout_ref: (H, A)      head weight (pre-transposed)
    bout_ref: (1, A)      head bias
    o_ref:    (B, A)      Q-values
    """
    L = w_ref.shape[0]
    h0 = x_ref[...].astype(jnp.float32)

    def layer(l, h):
        z = jnp.dot(h, w_ref[l], preferred_element_type=jnp.float32) + b_ref[l]
        # leaky_relu via max (one fewer VALU op than cmp+select)
        return jnp.maximum(z, NEG_SLOPE * z)

    h = lax.fori_loop(0, L, layer, h0, unroll=True)

    # Final projection (fc21) — no activation.
    out = jnp.dot(h, wout_ref[...],
                  preferred_element_type=jnp.float32) + bout_ref[...]
    o_ref[...] = out.astype(o_ref.dtype)


def deep_q_network_forward(state, w_stack, b_stack, w_out, b_out):
    """state: (B, H); w_stack: (L, H, H); b_stack: (L, 1, H);
    w_out: (H, A); b_out: (1, A). Returns (B, A) Q-values."""
    B, H = state.shape
    A = w_out.shape[1]

    vmem = pltpu.MemorySpace.VMEM
    return pl.pallas_call(
        _mlp_kernel,
        out_shape=jax.ShapeDtypeStruct((B, A), jnp.float32),
        # No grid: everything (≈82 KB of weights at H=32) is VMEM-resident
        # for a single kernel invocation.
        in_specs=[
            pl.BlockSpec(memory_space=vmem),  # state
            pl.BlockSpec(memory_space=vmem),  # hidden weight stack
            pl.BlockSpec(memory_space=vmem),  # hidden bias stack
            pl.BlockSpec(memory_space=vmem),  # head weight
            pl.BlockSpec(memory_space=vmem),  # head bias
        ],
        out_specs=pl.BlockSpec(memory_space=vmem),
    )(state, w_stack, b_stack, w_out, b_out)


def reference_forward(state, w_stack, b_stack, w_out, b_out):
    """Pure-JAX reference matching the PyTorch forward."""
    x = state
    for i in range(w_stack.shape[0]):
        z = x @ w_stack[i] + b_stack[i, 0]
        x = jnp.where(z > 0, z, NEG_SLOPE * z)
    return x @ w_out + b_out[0]


if __name__ == "__main__":
    # Small, consistent shapes: input_dims=(32,), fc1..fc20 all 32, n_actions=4.
    B = 8          # batch of states
    H = 32         # input_dims[0] == fc1_dims == ... == fc20_dims
    A = 4          # n_actions
    L = 20         # fc1 .. fc20 (hidden, leaky_relu); fc21 is the head

    key = jax.random.PRNGKey(0)
    k_state, k_w, k_b, k_wo, k_bo = jax.random.split(key, 5)

    state = jax.random.normal(k_state, (B, H), dtype=jnp.float32)

    # nn.Linear weights initialized with normal_(0, 0.1); stored here already
    # transposed to (in, out). Biases are deterministic synthetic values.
    w_stack = 0.1 * jax.random.normal(k_w, (L, H, H), dtype=jnp.float32)
    b_stack = 0.1 * jax.random.normal(k_b, (L, 1, H), dtype=jnp.float32)
    w_out = 0.1 * jax.random.normal(k_wo, (H, A), dtype=jnp.float32)
    b_out = 0.1 * jax.random.normal(k_bo, (1, A), dtype=jnp.float32)

    actions = deep_q_network_forward(state, w_stack, b_stack, w_out, b_out)
    actions = jax.block_until_ready(actions)

    expected = reference_forward(state, w_stack, b_stack, w_out, b_out)
    assert actions.shape == (B, A)
    assert jnp.allclose(actions, expected, atol=1e-4, rtol=1e-4), (
        "Pallas output mismatch vs reference")

    print("KERNEL_OK")
</pallas_src>

<mosaic_0001>
module attributes {stable_mosaic.version = 11 : i64} {
  func.func @_mlp_kernel(%arg0: memref<8x32xf32, #tpu.memory_space<vmem>>, %arg1: memref<20x32x32xf32, #tpu.memory_space<vmem>>, %arg2: memref<20x1x32xf32, #tpu.memory_space<vmem>>, %arg3: memref<32x4xf32, #tpu.memory_space<vmem>>, %arg4: memref<1x4xf32, #tpu.memory_space<vmem>>, %arg5: memref<8x4xf32, #tpu.memory_space<vmem>>) attributes {dimension_semantics = [], scalar_prefetch = 0 : i64, scratch_operands = 0 : i64, tpu.core_type = #tpu.core_type<tc>} {
    %c0 = arith.constant 0 : index
    %c0_0 = arith.constant 0 : index
    %0 = vector.load %arg0[%c0, %c0_0] : memref<8x32xf32, #tpu.memory_space<vmem>>, vector<8x32xf32>
    %c0_i32 = arith.constant 0 : i32
    %1 = arith.index_cast %c0_i32 : i32 to index
    %c0_1 = arith.constant 0 : index
    %c0_2 = arith.constant 0 : index
    %2 = vector.load %arg1[%1, %c0_1, %c0_2] : memref<20x32x32xf32, #tpu.memory_space<vmem>>, vector<1x32x32xf32>
    %3 = vector.shape_cast %2 : vector<1x32x32xf32> to vector<32x32xf32>
    %cst = arith.constant dense<0.000000e+00> : vector<8x32xf32>
    %4 = tpu.matmul %0, %3, %cst {dimension_numbers = #tpu.dot_dimension_numbers<[1], [0], [0], [1], [0, 0, 1, 1], [], []>} : vector<8x32xf32>, vector<32x32xf32>, vector<8x32xf32> -> vector<8x32xf32>
    %5 = arith.index_cast %c0_i32 : i32 to index
    %c0_3 = arith.constant 0 : index
    %c0_4 = arith.constant 0 : index
    %6 = vector.load %arg2[%5, %c0_3, %c0_4] : memref<20x1x32xf32, #tpu.memory_space<vmem>>, vector<1x1x32xf32>
    %7 = vector.shape_cast %6 : vector<1x1x32xf32> to vector<1x32xf32>
    %8 = vector.broadcast %7 : vector<1x32xf32> to vector<8x32xf32>
    %9 = arith.addf %4, %8 : vector<8x32xf32>
    %cst_5 = arith.constant 0.00999999977 : f32
    %10 = vector.broadcast %cst_5 : f32 to vector<8x32xf32>
    %11 = arith.mulf %10, %9 : vector<8x32xf32>
    %12 = arith.maximumf %9, %11 : vector<8x32xf32>
    %c1_i32 = arith.constant 1 : i32
    %13 = arith.index_cast %c1_i32 : i32 to index
    %c0_6 = arith.constant 0 : index
    %c0_7 = arith.constant 0 : index
    %14 = vector.load %arg1[%13, %c0_6, %c0_7] : memref<20x32x32xf32, #tpu.memory_space<vmem>>, vector<1x32x32xf32>
    %15 = vector.shape_cast %14 : vector<1x32x32xf32> to vector<32x32xf32>
    %cst_8 = arith.constant dense<0.000000e+00> : vector<8x32xf32>
    %16 = tpu.matmul %12, %15, %cst_8 {dimension_numbers = #tpu.dot_dimension_numbers<[1], [0], [0], [1], [0, 0, 1, 1], [], []>} : vector<8x32xf32>, vector<32x32xf32>, vector<8x32xf32> -> vector<8x32xf32>
    %17 = arith.index_cast %c1_i32 : i32 to index
    %c0_9 = arith.constant 0 : index
    %c0_10 = arith.constant 0 : index
    %18 = vector.load %arg2[%17, %c0_9, %c0_10] : memref<20x1x32xf32, #tpu.memory_space<vmem>>, vector<1x1x32xf32>
    %19 = vector.shape_cast %18 : vector<1x1x32xf32> to vector<1x32xf32>
    %20 = vector.broadcast %19 : vector<1x32xf32> to vector<8x32xf32>
    %21 = arith.addf %16, %20 : vector<8x32xf32>
    %cst_11 = arith.constant 0.00999999977 : f32
    %22 = vector.broadcast %cst_11 : f32 to vector<8x32xf32>
    %23 = arith.mulf %22, %21 : vector<8x32xf32>
    %24 = arith.maximumf %21, %23 : vector<8x32xf32>
    %c2_i32 = arith.constant 2 : i32
    %25 = arith.index_cast %c2_i32 : i32 to index
    %c0_12 = arith.constant 0 : index
    %c0_13 = arith.constant 0 : index
    %26 = vector.load %arg1[%25, %c0_12, %c0_13] : memref<20x32x32xf32, #tpu.memory_space<vmem>>, vector<1x32x32xf32>
    %27 = vector.shape_cast %26 : vector<1x32x32xf32> to vector<32x32xf32>
    %cst_14 = arith.constant dense<0.000000e+00> : vector<8x32xf32>
    %28 = tpu.matmul %24, %27, %cst_14 {dimension_numbers = #tpu.dot_dimension_numbers<[1], [0], [0], [1], [0, 0, 1, 1], [], []>} : vector<8x32xf32>, vector<32x32xf32>, vector<8x32xf32> -> vector<8x32xf32>
    %29 = arith.index_cast %c2_i32 : i32 to index
    %c0_15 = arith.constant 0 : index
    %c0_16 = arith.constant 0 : index
    %30 = vector.load %arg2[%29, %c0_15, %c0_16] : memref<20x1x32xf32, #tpu.memory_space<vmem>>, vector<1x1x32xf32>
    %31 = vector.shape_cast %30 : vector<1x1x32xf32> to vector<1x32xf32>
    %32 = vector.broadcast %31 : vector<1x32xf32> to vector<8x32xf32>
    %33 = arith.addf %28, %32 : vector<8x32xf32>
    %cst_17 = arith.constant 0.00999999977 : f32
    %34 = vector.broadcast %cst_17 : f32 to vector<8x32xf32>
    %35 = arith.mulf %34, %33 : vector<8x32xf32>
    %36 = arith.maximumf %33, %35 : vector<8x32xf32>
    %c3_i32 = arith.constant 3 : i32
    %37 = arith.index_cast %c3_i32 : i32 to index
    %c0_18 = arith.constant 0 : index
    %c0_19 = arith.constant 0 : index
    %38 = vector.load %arg1[%37, %c0_18, %c0_19] : memref<20x32x32xf32, #tpu.memory_space<vmem>>, vector<1x32x32xf32>
    %39 = vector.shape_cast %38 : vector<1x32x32xf32> to vector<32x32xf32>
    %cst_20 = arith.constant dense<0.000000e+00> : vector<8x32xf32>
    %40 = tpu.matmul %36, %39, %cst_20 {dimension_numbers = #tpu.dot_dimension_numbers<[1], [0], [0], [1], [0, 0, 1, 1], [], []>} : vector<8x32xf32>, vector<32x32xf32>, vector<8x32xf32> -> vector<8x32xf32>
    %41 = arith.index_cast %c3_i32 : i32 to index
    %c0_21 = arith.constant 0 : index
    %c0_22 = arith.constant 0 : index
    %42 = vector.load %arg2[%41, %c0_21, %c0_22] : memref<20x1x32xf32, #tpu.memory_space<vmem>>, vector<1x1x32xf32>
    %43 = vector.shape_cast %42 : vector<1x1x32xf32> to vector<1x32xf32>
    %44 = vector.broadcast %43 : vector<1x32xf32> to vector<8x32xf32>
    %45 = arith.addf %40, %44 : vector<8x32xf32>
    %cst_23 = arith.constant 0.00999999977 : f32
    %46 = vector.broadcast %cst_23 : f32 to vector<8x32xf32>
    %47 = arith.mulf %46, %45 : vector<8x32xf32>
    %48 = arith.maximumf %45, %47 : vector<8x32xf32>
    %c4_i32 = arith.constant 4 : i32
    %49 = arith.index_cast %c4_i32 : i32 to index
    %c0_24 = arith.constant 0 : index
    %c0_25 = arith.constant 0 : index
    %50 = vector.load %arg1[%49, %c0_24, %c0_25] : memref<20x32x32xf32, #tpu.memory_space<vmem>>, vector<1x32x32xf32>
    %51 = vector.shape_cast %50 : vector<1x32x32xf32> to vector<32x32xf32>
    %cst_26 = arith.constant dense<0.000000e+00> : vector<8x32xf32>
    %52 = tpu.matmul %48, %51, %cst_26 {dimension_numbers = #tpu.dot_dimension_numbers<[1], [0], [0], [1], [0, 0, 1, 1], [], []>} : vector<8x32xf32>, vector<32x32xf32>, vector<8x32xf32> -> vector<8x32xf32>
    %53 = arith.index_cast %c4_i32 : i32 to index
    %c0_27 = arith.constant 0 : index
    %c0_28 = arith.constant 0 : index
    %54 = vector.load %arg2[%53, %c0_27, %c0_28] : memref<20x1x32xf32, #tpu.memory_space<vmem>>, vector<1x1x32xf32>
    %55 = vector.shape_cast %54 : vector<1x1x32xf32> to vector<1x32xf32>
    %56 = vector.broadcast %55 : vector<1x32xf32> to vector<8x32xf32>
    %57 = arith.addf %52, %56 : vector<8x32xf32>
    %cst_29 = arith.constant 0.00999999977 : f32
    %58 = vector.broadcast %cst_29 : f32 to vector<8x32xf32>
    %59 = arith.mulf %58, %57 : vector<8x32xf32>
    %60 = arith.maximumf %57, %59 : vector<8x32xf32>
    %c5_i32 = arith.constant 5 : i32
    %61 = arith.index_cast %c5_i32 : i32 to index
    %c0_30 = arith.constant 0 : index
    %c0_31 = arith.constant 0 : index
    %62 = vector.load %arg1[%61, %c0_30, %c0_31] : memref<20x32x32xf32, #tpu.memory_space<vmem>>, vector<1x32x32xf32>
    %63 = vector.shape_cast %62 : vector<1x32x32xf32> to vector<32x32xf32>
    %cst_32 = arith.constant dense<0.000000e+00> : vector<8x32xf32>
    %64 = tpu.matmul %60, %63, %cst_32 {dimension_numbers = #tpu.dot_dimension_numbers<[1], [0], [0], [1], [0, 0, 1, 1], [], []>} : vector<8x32xf32>, vector<32x32xf32>, vector<8x32xf32> -> vector<8x32xf32>
    %65 = arith.index_cast %c5_i32 : i32 to index
    %c0_33 = arith.constant 0 : index
    %c0_34 = arith.constant 0 : index
    %66 = vector.load %arg2[%65, %c0_33, %c0_34] : memref<20x1x32xf32, #tpu.memory_space<vmem>>, vector<1x1x32xf32>
    %67 = vector.shape_cast %66 : vector<1x1x32xf32> to vector<1x32xf32>
    %68 = vector.broadcast %67 : vector<1x32xf32> to vector<8x32xf32>
    %69 = arith.addf %64, %68 : vector<8x32xf32>
    %cst_35 = arith.constant 0.00999999977 : f32
    %70 = vector.broadcast %cst_35 : f32 to vector<8x32xf32>
    %71 = arith.mulf %70, %69 : vector<8x32xf32>
    %72 = arith.maximumf %69, %71 : vector<8x32xf32>
    %c6_i32 = arith.constant 6 : i32
    %73 = arith.index_cast %c6_i32 : i32 to index
    %c0_36 = arith.constant 0 : index
    %c0_37 = arith.constant 0 : index
    %74 = vector.load %arg1[%73, %c0_36, %c0_37] : memref<20x32x32xf32, #tpu.memory_space<vmem>>, vector<1x32x32xf32>
    %75 = vector.shape_cast %74 : vector<1x32x32xf32> to vector<32x32xf32>
    %cst_38 = arith.constant dense<0.000000e+00> : vector<8x32xf32>
    %76 = tpu.matmul %72, %75, %cst_38 {dimension_numbers = #tpu.dot_dimension_numbers<[1], [0], [0], [1], [0, 0, 1, 1], [], []>} : vector<8x32xf32>, vector<32x32xf32>, vector<8x32xf32> -> vector<8x32xf32>
    %77 = arith.index_cast %c6_i32 : i32 to index
    %c0_39 = arith.constant 0 : index
    %c0_40 = arith.constant 0 : index
    %78 = vector.load %arg2[%77, %c0_39, %c0_40] : memref<20x1x32xf32, #tpu.memory_space<vmem>>, vector<1x1x32xf32>
    %79 = vector.shape_cast %78 : vector<1x1x32xf32> to vector<1x32xf32>
    %80 = vector.broadcast %79 : vector<1x32xf32> to vector<8x32xf32>
    %81 = arith.addf %76, %80 : vector<8x32xf32>
    %cst_41 = arith.constant 0.00999999977 : f32
    %82 = vector.broadcast %cst_41 : f32 to vector<8x32xf32>
    %83 = arith.mulf %82, %81 : vector<8x32xf32>
    %84 = arith.maximumf %81, %83 : vector<8x32xf32>
    %c7_i32 = arith.constant 7 : i32
    %85 = arith.index_cast %c7_i32 : i32 to index
    %c0_42 = arith.constant 0 : index
    %c0_43 = arith.constant 0 : index
    %86 = vector.load %arg1[%85, %c0_42, %c0_43] : memref<20x32x32xf32, #tpu.memory_space<vmem>>, vector<1x32x32xf32>
    %87 = vector.shape_cast %86 : vector<1x32x32xf32> to vector<32x32xf32>
    %cst_44 = arith.constant dense<0.000000e+00> : vector<8x32xf32>
    %88 = tpu.matmul %84, %87, %cst_44 {dimension_numbers = #tpu.dot_dimension_numbers<[1], [0], [0], [1], [0, 0, 1, 1], [], []>} : vector<8x32xf32>, vector<32x32xf32>, vector<8x32xf32> -> vector<8x32xf32>
    %89 = arith.index_cast %c7_i32 : i32 to index
    %c0_45 = arith.constant 0 : index
    %c0_46 = arith.constant 0 : index
    %90 = vector.load %arg2[%89, %c0_45, %c0_46] : memref<20x1x32xf32, #tpu.memory_space<vmem>>, vector<1x1x32xf32>
    %91 = vector.shape_cast %90 : vector<1x1x32xf32> to vector<1x32xf32>
    %92 = vector.broadcast %91 : vector<1x32xf32> to vector<8x32xf32>
    %93 = arith.addf %88, %92 : vector<8x32xf32>
    %cst_47 = arith.constant 0.00999999977 : f32
    %94 = vector.broadcast %cst_47 : f32 to vector<8x32xf32>
    %95 = arith.mulf %94, %93 : vector<8x32xf32>
    %96 = arith.maximumf %93, %95 : vector<8x32xf32>
    %c8_i32 = arith.constant 8 : i32
    %97 = arith.index_cast %c8_i32 : i32 to index
    %c0_48 = arith.constant 0 : index
    %c0_49 = arith.constant 0 : index
    %98 = vector.load %arg1[%97, %c0_48, %c0_49] : memref<20x32x32xf32, #tpu.memory_space<vmem>>, vector<1x32x32xf32>
    %99 = vector.shape_cast %98 : vector<1x32x32xf32> to vector<32x32xf32>
    %cst_50 = arith.constant dense<0.000000e+00> : vector<8x32xf32>
    %100 = tpu.matmul %96, %99, %cst_50 {dimension_numbers = #tpu.dot_dimension_numbers<[1], [0], [0], [1], [0, 0, 1, 1], [], []>} : vector<8x32xf32>, vector<32x32xf32>, vector<8x32xf32> -> vector<8x32xf32>
    %101 = arith.index_cast %c8_i32 : i32 to index
    %c0_51 = arith.constant 0 : index
    %c0_52 = arith.constant 0 : index
    %102 = vector.load %arg2[%101, %c0_51, %c0_52] : memref<20x1x32xf32, #tpu.memory_space<vmem>>, vector<1x1x32xf32>
    %103 = vector.shape_cast %102 : vector<1x1x32xf32> to vector<1x32xf32>
    %104 = vector.broadcast %103 : vector<1x32xf32> to vector<8x32xf32>
    %105 = arith.addf %100, %104 : vector<8x32xf32>
    %cst_53 = arith.constant 0.00999999977 : f32
    %106 = vector.broadcast %cst_53 : f32 to vector<8x32xf32>
    %107 = arith.mulf %106, %105 : vector<8x32xf32>
    %108 = arith.maximumf %105, %107 : vector<8x32xf32>
    %c9_i32 = arith.constant 9 : i32
    %109 = arith.index_cast %c9_i32 : i32 to index
    %c0_54 = arith.constant 0 : index
    %c0_55 = arith.constant 0 : index
    %110 = vector.load %arg1[%109, %c0_54, %c0_55] : memref<20x32x32xf32, #tpu.memory_space<vmem>>, vector<1x32x32xf32>
    %111 = vector.shape_cast %110 : vector<1x32x32xf32> to vector<32x32xf32>
    %cst_56 = arith.constant dense<0.000000e+00> : vector<8x32xf32>
    %112 = tpu.matmul %108, %111, %cst_56 {dimension_numbers = #tpu.dot_dimension_numbers<[1], [0], [0], [1], [0, 0, 1, 1], [], []>} : vector<8x32xf32>, vector<32x32xf32>, vector<8x32xf32> -> vector<8x32xf32>
    %113 = arith.index_cast %c9_i32 : i32 to index
    %c0_57 = arith.constant 0 : index
    %c0_58 = arith.constant 0 : index
    %114 = vector.load %arg2[%113, %c0_57, %c0_58] : memref<20x1x32xf32, #tpu.memory_space<vmem>>, vector<1x1x32xf32>
    %115 = vector.shape_cast %114 : vector<1x1x32xf32> to vector<1x32xf32>
    %116 = vector.broadcast %115 : vector<1x32xf32> to vector<8x32xf32>
    %117 = arith.addf %112, %116 : vector<8x32xf32>
    %cst_59 = arith.constant 0.00999999977 : f32
    %118 = vector.broadcast %cst_59 : f32 to vector<8x32xf32>
    %119 = arith.mulf %118, %117 : vector<8x32xf32>
    %120 = arith.maximumf %117, %119 : vector<8x32xf32>
    %c10_i32 = arith.constant 10 : i32
    %121 = arith.index_cast %c10_i32 : i32 to index
    %c0_60 = arith.constant 0 : index
    %c0_61 = arith.constant 0 : index
    %122 = vector.load %arg1[%121, %c0_60, %c0_61] : memref<20x32x32xf32, #tpu.memory_space<vmem>>, vector<1x32x32xf32>
    %123 = vector.shape_cast %122 : vector<1x32x32xf32> to vector<32x32xf32>
    %cst_62 = arith.constant dense<0.000000e+00> : vector<8x32xf32>
    %124 = tpu.matmul %120, %123, %cst_62 {dimension_numbers = #tpu.dot_dimension_numbers<[1], [0], [0], [1], [0, 0, 1, 1], [], []>} : vector<8x32xf32>, vector<32x32xf32>, vector<8x32xf32> -> vector<8x32xf32>
    %125 = arith.index_cast %c10_i32 : i32 to index
    %c0_63 = arith.constant 0 : index
    %c0_64 = arith.constant 0 : index
    %126 = vector.load %arg2[%125, %c0_63, %c0_64] : memref<20x1x32xf32, #tpu.memory_space<vmem>>, vector<1x1x32xf32>
    %127 = vector.shape_cast %126 : vector<1x1x32xf32> to vector<1x32xf32>
    %128 = vector.broadcast %127 : vector<1x32xf32> to vector<8x32xf32>
    %129 = arith.addf %124, %128 : vector<8x32xf32>
    %cst_65 = arith.constant 0.00999999977 : f32
    %130 = vector.broadcast %cst_65 : f32 to vector<8x32xf32>
    %131 = arith.mulf %130, %129 : vector<8x32xf32>
    %132 = arith.maximumf %129, %131 : vector<8x32xf32>
    %c11_i32 = arith.constant 11 : i32
    %133 = arith.index_cast %c11_i32 : i32 to index
    %c0_66 = arith.constant 0 : index
    %c0_67 = arith.constant 0 : index
    %134 = vector.load %arg1[%133, %c0_66, %c0_67] : memref<20x32x32xf32, #tpu.memory_space<vmem>>, vector<1x32x32xf32>
    %135 = vector.shape_cast %134 : vector<1x32x32xf32> to vector<32x32xf32>
    %cst_68 = arith.constant dense<0.000000e+00> : vector<8x32xf32>
    %136 = tpu.matmul %132, %135, %cst_68 {dimension_numbers = #tpu.dot_dimension_numbers<[1], [0], [0], [1], [0, 0, 1, 1], [], []>} : vector<8x32xf32>, vector<32x32xf32>, vector<8x32xf32> -> vector<8x32xf32>
    %137 = arith.index_cast %c11_i32 : i32 to index
    %c0_69 = arith.constant 0 : index
    %c0_70 = arith.constant 0 : index
    %138 = vector.load %arg2[%137, %c0_69, %c0_70] : memref<20x1x32xf32, #tpu.memory_space<vmem>>, vector<1x1x32xf32>
    %139 = vector.shape_cast %138 : vector<1x1x32xf32> to vector<1x32xf32>
    %140 = vector.broadcast %139 : vector<1x32xf32> to vector<8x32xf32>
    %141 = arith.addf %136, %140 : vector<8x32xf32>
    %cst_71 = arith.constant 0.00999999977 : f32
    %142 = vector.broadcast %cst_71 : f32 to vector<8x32xf32>
    %143 = arith.mulf %142, %141 : vector<8x32xf32>
    %144 = arith.maximumf %141, %143 : vector<8x32xf32>
    %c12_i32 = arith.constant 12 : i32
    %145 = arith.index_cast %c12_i32 : i32 to index
    %c0_72 = arith.constant 0 : index
    %c0_73 = arith.constant 0 : index
    %146 = vector.load %arg1[%145, %c0_72, %c0_73] : memref<20x32x32xf32, #tpu.memory_space<vmem>>, vector<1x32x32xf32>
    %147 = vector.shape_cast %146 : vector<1x32x32xf32> to vector<32x32xf32>
    %cst_74 = arith.constant dense<0.000000e+00> : vector<8x32xf32>
    %148 = tpu.matmul %144, %147, %cst_74 {dimension_numbers = #tpu.dot_dimension_numbers<[1], [0], [0], [1], [0, 0, 1, 1], [], []>} : vector<8x32xf32>, vector<32x32xf32>, vector<8x32xf32> -> vector<8x32xf32>
    %149 = arith.index_cast %c12_i32 : i32 to index
    %c0_75 = arith.constant 0 : index
    %c0_76 = arith.constant 0 : index
    %150 = vector.load %arg2[%149, %c0_75, %c0_76] : memref<20x1x32xf32, #tpu.memory_space<vmem>>, vector<1x1x32xf32>
    %151 = vector.shape_cast %150 : vector<1x1x32xf32> to vector<1x32xf32>
    %152 = vector.broadcast %151 : vector<1x32xf32> to vector<8x32xf32>
    %153 = arith.addf %148, %152 : vector<8x32xf32>
    %cst_77 = arith.constant 0.00999999977 : f32
    %154 = vector.broadcast %cst_77 : f32 to vector<8x32xf32>
    %155 = arith.mulf %154, %153 : vector<8x32xf32>
    %156 = arith.maximumf %153, %155 : vector<8x32xf32>
    %c13_i32 = arith.constant 13 : i32
    %157 = arith.index_cast %c13_i32 : i32 to index
    %c0_78 = arith.constant 0 : index
    %c0_79 = arith.constant 0 : index
    %158 = vector.load %arg1[%157, %c0_78, %c0_79] : memref<20x32x32xf32, #tpu.memory_space<vmem>>, vector<1x32x32xf32>
    %159 = vector.shape_cast %158 : vector<1x32x32xf32> to vector<32x32xf32>
    %cst_80 = arith.constant dense<0.000000e+00> : vector<8x32xf32>
    %160 = tpu.matmul %156, %159, %cst_80 {dimension_numbers = #tpu.dot_dimension_numbers<[1], [0], [0], [1], [0, 0, 1, 1], [], []>} : vector<8x32xf32>, vector<32x32xf32>, vector<8x32xf32> -> vector<8x32xf32>
    %161 = arith.index_cast %c13_i32 : i32 to index
    %c0_81 = arith.constant 0 : index
    %c0_82 = arith.constant 0 : index
    %162 = vector.load %arg2[%161, %c0_81, %c0_82] : memref<20x1x32xf32, #tpu.memory_space<vmem>>, vector<1x1x32xf32>
    %163 = vector.shape_cast %162 : vector<1x1x32xf32> to vector<1x32xf32>
    %164 = vector.broadcast %163 : vector<1x32xf32> to vector<8x32xf32>
    %165 = arith.addf %160, %164 : vector<8x32xf32>
    %cst_83 = arith.constant 0.00999999977 : f32
    %166 = vector.broadcast %cst_83 : f32 to vector<8x32xf32>
    %167 = arith.mulf %166, %165 : vector<8x32xf32>
    %168 = arith.maximumf %165, %167 : vector<8x32xf32>
    %c14_i32 = arith.constant 14 : i32
    %169 = arith.index_cast %c14_i32 : i32 to index
    %c0_84 = arith.constant 0 : index
    %c0_85 = arith.constant 0 : index
    %170 = vector.load %arg1[%169, %c0_84, %c0_85] : memref<20x32x32xf32, #tpu.memory_space<vmem>>, vector<1x32x32xf32>
    %171 = vector.shape_cast %170 : vector<1x32x32xf32> to vector<32x32xf32>
    %cst_86 = arith.constant dense<0.000000e+00> : vector<8x32xf32>
    %172 = tpu.matmul %168, %171, %cst_86 {dimension_numbers = #tpu.dot_dimension_numbers<[1], [0], [0], [1], [0, 0, 1, 1], [], []>} : vector<8x32xf32>, vector<32x32xf32>, vector<8x32xf32> -> vector<8x32xf32>
    %173 = arith.index_cast %c14_i32 : i32 to index
    %c0_87 = arith.constant 0 : index
    %c0_88 = arith.constant 0 : index
    %174 = vector.load %arg2[%173, %c0_87, %c0_88] : memref<20x1x32xf32, #tpu.memory_space<vmem>>, vector<1x1x32xf32>
    %175 = vector.shape_cast %174 : vector<1x1x32xf32> to vector<1x32xf32>
    %176 = vector.broadcast %175 : vector<1x32xf32> to vector<8x32xf32>
    %177 = arith.addf %172, %176 : vector<8x32xf32>
    %cst_89 = arith.constant 0.00999999977 : f32
    %178 = vector.broadcast %cst_89 : f32 to vector<8x32xf32>
    %179 = arith.mulf %178, %177 : vector<8x32xf32>
    %180 = arith.maximumf %177, %179 : vector<8x32xf32>
    %c15_i32 = arith.constant 15 : i32
    %181 = arith.index_cast %c15_i32 : i32 to index
    %c0_90 = arith.constant 0 : index
    %c0_91 = arith.constant 0 : index
    %182 = vector.load %arg1[%181, %c0_90, %c0_91] : memref<20x32x32xf32, #tpu.memory_space<vmem>>, vector<1x32x32xf32>
    %183 = vector.shape_cast %182 : vector<1x32x32xf32> to vector<32x32xf32>
    %cst_92 = arith.constant dense<0.000000e+00> : vector<8x32xf32>
    %184 = tpu.matmul %180, %183, %cst_92 {dimension_numbers = #tpu.dot_dimension_numbers<[1], [0], [0], [1], [0, 0, 1, 1], [], []>} : vector<8x32xf32>, vector<32x32xf32>, vector<8x32xf32> -> vector<8x32xf32>
    %185 = arith.index_cast %c15_i32 : i32 to index
    %c0_93 = arith.constant 0 : index
    %c0_94 = arith.constant 0 : index
    %186 = vector.load %arg2[%185, %c0_93, %c0_94] : memref<20x1x32xf32, #tpu.memory_space<vmem>>, vector<1x1x32xf32>
    %187 = vector.shape_cast %186 : vector<1x1x32xf32> to vector<1x32xf32>
    %188 = vector.broadcast %187 : vector<1x32xf32> to vector<8x32xf32>
    %189 = arith.addf %184, %188 : vector<8x32xf32>
    %cst_95 = arith.constant 0.00999999977 : f32
    %190 = vector.broadcast %cst_95 : f32 to vector<8x32xf32>
    %191 = arith.mulf %190, %189 : vector<8x32xf32>
    %192 = arith.maximumf %189, %191 : vector<8x32xf32>
    %c16_i32 = arith.constant 16 : i32
    %193 = arith.index_cast %c16_i32 : i32 to index
    %c0_96 = arith.constant 0 : index
    %c0_97 = arith.constant 0 : index
    %194 = vector.load %arg1[%193, %c0_96, %c0_97] : memref<20x32x32xf32, #tpu.memory_space<vmem>>, vector<1x32x32xf32>
    %195 = vector.shape_cast %194 : vector<1x32x32xf32> to vector<32x32xf32>
    %cst_98 = arith.constant dense<0.000000e+00> : vector<8x32xf32>
    %196 = tpu.matmul %192, %195, %cst_98 {dimension_numbers = #tpu.dot_dimension_numbers<[1], [0], [0], [1], [0, 0, 1, 1], [], []>} : vector<8x32xf32>, vector<32x32xf32>, vector<8x32xf32> -> vector<8x32xf32>
    %197 = arith.index_cast %c16_i32 : i32 to index
    %c0_99 = arith.constant 0 : index
    %c0_100 = arith.constant 0 : index
    %198 = vector.load %arg2[%197, %c0_99, %c0_100] : memref<20x1x32xf32, #tpu.memory_space<vmem>>, vector<1x1x32xf32>
    %199 = vector.shape_cast %198 : vector<1x1x32xf32> to vector<1x32xf32>
    %200 = vector.broadcast %199 : vector<1x32xf32> to vector<8x32xf32>
    %201 = arith.addf %196, %200 : vector<8x32xf32>
    %cst_101 = arith.constant 0.00999999977 : f32
    %202 = vector.broadcast %cst_101 : f32 to vector<8x32xf32>
    %203 = arith.mulf %202, %201 : vector<8x32xf32>
    %204 = arith.maximumf %201, %203 : vector<8x32xf32>
    %c17_i32 = arith.constant 17 : i32
    %205 = arith.index_cast %c17_i32 : i32 to index
    %c0_102 = arith.constant 0 : index
    %c0_103 = arith.constant 0 : index
    %206 = vector.load %arg1[%205, %c0_102, %c0_103] : memref<20x32x32xf32, #tpu.memory_space<vmem>>, vector<1x32x32xf32>
    %207 = vector.shape_cast %206 : vector<1x32x32xf32> to vector<32x32xf32>
    %cst_104 = arith.constant dense<0.000000e+00> : vector<8x32xf32>
    %208 = tpu.matmul %204, %207, %cst_104 {dimension_numbers = #tpu.dot_dimension_numbers<[1], [0], [0], [1], [0, 0, 1, 1], [], []>} : vector<8x32xf32>, vector<32x32xf32>, vector<8x32xf32> -> vector<8x32xf32>
    %209 = arith.index_cast %c17_i32 : i32 to index
    %c0_105 = arith.constant 0 : index
    %c0_106 = arith.constant 0 : index
    %210 = vector.load %arg2[%209, %c0_105, %c0_106] : memref<20x1x32xf32, #tpu.memory_space<vmem>>, vector<1x1x32xf32>
    %211 = vector.shape_cast %210 : vector<1x1x32xf32> to vector<1x32xf32>
    %212 = vector.broadcast %211 : vector<1x32xf32> to vector<8x32xf32>
    %213 = arith.addf %208, %212 : vector<8x32xf32>
    %cst_107 = arith.constant 0.00999999977 : f32
    %214 = vector.broadcast %cst_107 : f32 to vector<8x32xf32>
    %215 = arith.mulf %214, %213 : vector<8x32xf32>
    %216 = arith.maximumf %213, %215 : vector<8x32xf32>
    %c18_i32 = arith.constant 18 : i32
    %217 = arith.index_cast %c18_i32 : i32 to index
    %c0_108 = arith.constant 0 : index
    %c0_109 = arith.constant 0 : index
    %218 = vector.load %arg1[%217, %c0_108, %c0_109] : memref<20x32x32xf32, #tpu.memory_space<vmem>>, vector<1x32x32xf32>
    %219 = vector.shape_cast %218 : vector<1x32x32xf32> to vector<32x32xf32>
    %cst_110 = arith.constant dense<0.000000e+00> : vector<8x32xf32>
    %220 = tpu.matmul %216, %219, %cst_110 {dimension_numbers = #tpu.dot_dimension_numbers<[1], [0], [0], [1], [0, 0, 1, 1], [], []>} : vector<8x32xf32>, vector<32x32xf32>, vector<8x32xf32> -> vector<8x32xf32>
    %221 = arith.index_cast %c18_i32 : i32 to index
    %c0_111 = arith.constant 0 : index
    %c0_112 = arith.constant 0 : index
    %222 = vector.load %arg2[%221, %c0_111, %c0_112] : memref<20x1x32xf32, #tpu.memory_space<vmem>>, vector<1x1x32xf32>
    %223 = vector.shape_cast %222 : vector<1x1x32xf32> to vector<1x32xf32>
    %224 = vector.broadcast %223 : vector<1x32xf32> to vector<8x32xf32>
    %225 = arith.addf %220, %224 : vector<8x32xf32>
    %cst_113 = arith.constant 0.00999999977 : f32
    %226 = vector.broadcast %cst_113 : f32 to vector<8x32xf32>
    %227 = arith.mulf %226, %225 : vector<8x32xf32>
    %228 = arith.maximumf %225, %227 : vector<8x32xf32>
    %c19_i32 = arith.constant 19 : i32
    %229 = arith.index_cast %c19_i32 : i32 to index
    %c0_114 = arith.constant 0 : index
    %c0_115 = arith.constant 0 : index
    %230 = vector.load %arg1[%229, %c0_114, %c0_115] : memref<20x32x32xf32, #tpu.memory_space<vmem>>, vector<1x32x32xf32>
    %231 = vector.shape_cast %230 : vector<1x32x32xf32> to vector<32x32xf32>
    %cst_116 = arith.constant dense<0.000000e+00> : vector<8x32xf32>
    %232 = tpu.matmul %228, %231, %cst_116 {dimension_numbers = #tpu.dot_dimension_numbers<[1], [0], [0], [1], [0, 0, 1, 1], [], []>} : vector<8x32xf32>, vector<32x32xf32>, vector<8x32xf32> -> vector<8x32xf32>
    %233 = arith.index_cast %c19_i32 : i32 to index
    %c0_117 = arith.constant 0 : index
    %c0_118 = arith.constant 0 : index
    %234 = vector.load %arg2[%233, %c0_117, %c0_118] : memref<20x1x32xf32, #tpu.memory_space<vmem>>, vector<1x1x32xf32>
    %235 = vector.shape_cast %234 : vector<1x1x32xf32> to vector<1x32xf32>
    %236 = vector.broadcast %235 : vector<1x32xf32> to vector<8x32xf32>
    %237 = arith.addf %232, %236 : vector<8x32xf32>
    %cst_119 = arith.constant 0.00999999977 : f32
    %238 = vector.broadcast %cst_119 : f32 to vector<8x32xf32>
    %239 = arith.mulf %238, %237 : vector<8x32xf32>
    %240 = arith.maximumf %237, %239 : vector<8x32xf32>
    %c20_i32 = arith.constant 20 : i32
    %c0_120 = arith.constant 0 : index
    %c0_121 = arith.constant 0 : index
    %241 = vector.load %arg3[%c0_120, %c0_121] : memref<32x4xf32, #tpu.memory_space<vmem>>, vector<32x4xf32>
    %cst_122 = arith.constant dense<0.000000e+00> : vector<8x4xf32>
    %242 = tpu.matmul %240, %241, %cst_122 {dimension_numbers = #tpu.dot_dimension_numbers<[1], [0], [0], [1], [0, 0, 1, 1], [], []>} : vector<8x32xf32>, vector<32x4xf32>, vector<8x4xf32> -> vector<8x4xf32>
    %c0_123 = arith.constant 0 : index
    %c0_124 = arith.constant 0 : index
    %243 = vector.load %arg4[%c0_123, %c0_124] : memref<1x4xf32, #tpu.memory_space<vmem>>, vector<1x4xf32>
    %244 = vector.broadcast %243 : vector<1x4xf32> to vector<8x4xf32>
    %245 = arith.addf %242, %244 : vector<8x4xf32>
    %c0_125 = arith.constant 0 : index
    %c0_126 = arith.constant 0 : index
    %246 = vector.load %arg5[%c0_125, %c0_126] : memref<8x4xf32, #tpu.memory_space<vmem>>, vector<8x4xf32>
    tpu.vector_store %arg5[%c0_125, %c0_126], %245 {strides = array<i32>} : memref<8x4xf32, #tpu.memory_space<vmem>>, vector<8x4xf32>,
    return
  }
}

</mosaic_0001>

<bundles_post_ra>
// kernel: tpu_custom_call.1
= control target key start
LH: loop header
LB: loop body
LE: loop exit
PB: predicated region body
PF: predicated region fallthrough
CT: control target
= control target key end

     0   :  { %10 = vsyncpa [#allocation3], 0  ;;  %s864_s21 = smov [#allocation2]   ;;  %s865_s23 = smov 128   ;;  %s1002_s0 = inlined_call_operand.vmem [shape: f32[8,32], index: 0, kind: input, shape index: {}]   ;;  %s1003_s1 = inlined_call_operand.hbm [shape: f32[20,32,32], index: 1, kind: input, shape index: {}]   ;;  %s1004_s2 = inlined_call_operand.vmem [shape: f32[20,1,32], index: 2, kind: input, shape index: {}]   ;;  %s1005_s3 = inlined_call_operand.vmem [shape: f32[32,4], index: 3, kind: input, shape index: {}]   ;;  %s1006_s4 = inlined_call_operand.vmem [shape: f32[1,4], index: 4, kind: input, shape index: {}]   ;;  %s1007_s5 = inlined_call_operand.vmem [shape: f32[8,4], index: 5, kind: output, shape index: {}]  }
   0x1   :  { %s17_s20 = sshll.u32 %s1003_s1, 4  ;;  %s19_s22 = sshll.u32 %s864_s21, 4  ;;  %s18_s20 = int_to_ptr.hbm [resolvable:$true] %s17_s20  ;;  %s20_s22 = int_to_ptr.vmem [resolvable:$true] %s19_s22 }
   0x2   :  { %s866_s24 = smov 8  }
   0x3   :  { %25 = dma.hbm_to_vmem [thread:$0]  %s18_s20, 10240, %s20_s22, [#allocation3], %s865_s23, %s865_s23, %s866_s24  }
   0x4   :  { %862 = dma.done.wait [#allocation3], 10240  }
   0x5   :  { %863 = vsyncadd [#allocation3], 4294957056  ;;  %v40_v0 = vld [vmem:[#allocation2 + $0x18] sm:$0xff]  ;;  %v39_v1 = vld [vmem:[#allocation2 + $0x10] sm:$0xff]  ;;  %vm45_vm0 = vcmask 261120   ;;  %vm767_vm1 = vcmask 31744  }
   0x6   :  { %61 = vmatpush.msra.mxu0 %v40_v0  ;;  %v38_v2 = vld [vmem:[#allocation2 + $0x8] sm:$0xff]  ;;  %v37_v3 = vld [vmem:[#allocation2] sm:$0xff]  ;;  %v75_v5 = vld [vmem:[#allocation2 + $0x38] sm:$0xff] }
   0x7   :  { %v36_v4 = vld [vmem:[%s1002_s0] sm:$0xff]  ;;  %96 = vmatpush.msra.mxu1 %v75_v5  ;;  %v74_v6 = vld [vmem:[#allocation2 + $0x30] sm:$0xff]  ;;  %v73_v7 = vld [vmem:[#allocation2 + $0x28] sm:$0xff] }
   0x8   :  { %62 = vmatpush.msra.mxu0 %v39_v1  ;;  %v72_v8 = vld [vmem:[#allocation2 + $0x20] sm:$0xff]  ;;  %v110_v14 = vld [vmem:[#allocation2 + $0x58] sm:$0xff]  ;;  %v109_v15 = vld [vmem:[#allocation2 + $0x50] sm:$0xff] }
   0x9   :  { %97 = vmatpush.msra.mxu1 %v74_v6  ;;  %v817_v9 = vld [vmem:[%s1004_s2] ss:$0 sm:$0xff]  ;;  %131 = vmatpush.msra.mxu2 %v110_v14  ;;  %v108_v16 = vld [vmem:[#allocation2 + $0x48] sm:$0xff]  ;;  %v818_v18 = vld [vmem:[%s1004_s2 + $0x1] ss:$0 sm:$0xff] }
   0xa   :  { %63 = vmatpush.msra.mxu0 %v38_v2  ;;  %v107_v17 = vld [vmem:[#allocation2 + $0x40] sm:$0xff]  ;;  %v145_v23 = vld [vmem:[#allocation2 + $0x78] sm:$0xff]  ;;  %v144_v24 = vld [vmem:[#allocation2 + $0x70] sm:$0xff] }
   0xb   :  { %98 = vmatpush.msra.mxu1 %v73_v7  ;;  %132 = vmatpush.msra.mxu2 %v109_v15  ;;  %v143_v25 = vld [vmem:[#allocation2 + $0x68] sm:$0xff]  ;;  %v142_v26 = vld [vmem:[#allocation2 + $0x60] sm:$0xff]  ;;  %v180_v27 = vld [vmem:[#allocation2 + $0x98] sm:$0xff] }
   0xc   :  { %64 = vmatpush.msra.mxu0 %v37_v3  ;;  %166 = vmatpush.msra.mxu3 %v145_v23  ;;  %v819_v28 = vld [vmem:[%s1004_s2 + $0x2] ss:$0 sm:$0xff]  ;;  %v179_v33 = vld [vmem:[#allocation2 + $0x90] sm:$0xff]  ;;  %v178_v34 = vld [vmem:[#allocation2 + $0x88] sm:$0xff] }
   0xd   :  { %774 = vmatmul.msk.f32.vlgmr.msra.gmra.mxu0 %vm45_vm0, %v36_v4  ;;  %99 = vmatpush.msra.mxu1 %v72_v8  ;;  %v177_v35 = vld [vmem:[#allocation2 + $0x80] sm:$0xff]  ;;  %v215_v36 = vld [vmem:[#allocation2 + $0xb8] sm:$0xff]  ;;  %v214_v42 = vld [vmem:[#allocation2 + $0xb0] sm:$0xff] }
   0xe   :  { %133 = vmatpush.msra.mxu2 %v108_v16  ;;  %167 = vmatpush.msra.mxu3 %v144_v24  ;;  %v820_v37 = vld [vmem:[%s1004_s2 + $0x3] ss:$0 sm:$0xff]  ;;  %v213_v43 = vld [vmem:[#allocation2 + $0xa8] sm:$0xff]  ;;  %v250_v45 = vld [vmem:[#allocation2 + $0xd8] sm:$0xff] }
   0xf   :  { %201 = vmatpush.msrb.mxu0 %v180_v27  ;;  %236 = vmatpush.msrb.mxu1 %v215_v36  ;;  %v212_v44 = vld [vmem:[#allocation2 + $0xa0] sm:$0xff]  ;;  %v249_v51 = vld [vmem:[#allocation2 + $0xd0] sm:$0xff]  ;;  %v248_v52 = vld [vmem:[#allocation2 + $0xc8] sm:$0xff] }
  0x10   :  { %134 = vmatpush.msra.mxu2 %v107_v17  ;;  %168 = vmatpush.msra.mxu3 %v143_v25  ;;  %v821_v46 = vld [vmem:[%s1004_s2 + $0x4] ss:$0 sm:$0xff]  ;;  %v285_v54 = vld [vmem:[#allocation2 + $0xf8] sm:$0xff]  ;;  %v822_v55 = vld [vmem:[%s1004_s2 + $0x5] ss:$0 sm:$0xff] }
  0x11   :  { %202 = vmatpush.msrb.mxu0 %v179_v33  ;;  %237 = vmatpush.msrb.mxu1 %v214_v42  ;;  %v247_v53 = vld [vmem:[#allocation2 + $0xc0] sm:$0xff]  ;;  %v284_v60 = vld [vmem:[#allocation2 + $0xf0] sm:$0xff]  ;;  %v283_v61 = vld [vmem:[#allocation2 + $0xe8] sm:$0xff] }
  0x12   :  { %169 = vmatpush.msra.mxu3 %v142_v26  ;;  %271 = vmatpush.msrb.mxu2 %v250_v45  ;;  %v282_v62 = vld [vmem:[#allocation2 + $0xe0] sm:$0xff]  ;;  %v320_v63 = vld [vmem:[#allocation2 + $0x118] sm:$0xff]  ;;  %v319_v5 = vld [vmem:[#allocation2 + $0x110] sm:$0xff] }
  0x13   :  { %203 = vmatpush.msrb.mxu0 %v178_v34  ;;  %238 = vmatpush.msrb.mxu1 %v213_v43  ;;  %v823_v0 = vld [vmem:[%s1004_s2 + $0x6] ss:$0 sm:$0xff]  ;;  %v318_v6 = vld [vmem:[#allocation2 + $0x108] sm:$0xff]  ;;  %v355_v8 = vld [vmem:[#allocation2 + $0x138] sm:$0xff] }
  0x14   :  { %272 = vmatpush.msrb.mxu2 %v249_v51  ;;  %306 = vmatpush.msrb.mxu3 %v285_v54  ;;  %v317_v7 = vld [vmem:[#allocation2 + $0x100] sm:$0xff]  ;;  %v354_v14 = vld [vmem:[#allocation2 + $0x130] sm:$0xff]  ;;  %v353_v15 = vld [vmem:[#allocation2 + $0x128] sm:$0xff] }
  0x15   :  { %204 = vmatpush.msrb.mxu0 %v177_v35  ;;  %239 = vmatpush.msrb.mxu1 %v212_v44  ;;  %v352_v16 = vld [vmem:[#allocation2 + $0x120] sm:$0xff]  ;;  %v390_v17 = vld [vmem:[#allocation2 + $0x158] sm:$0xff]  ;;  %v389_v23 = vld [vmem:[#allocation2 + $0x150] sm:$0xff] }
  0x16   :  { %273 = vmatpush.msrb.mxu2 %v248_v52  ;;  %307 = vmatpush.msrb.mxu3 %v284_v60  ;;  %v388_v24 = vld [vmem:[#allocation2 + $0x148] sm:$0xff]  ;;  %v387_v25 = vld [vmem:[#allocation2 + $0x140] sm:$0xff]  ;;  %v425_v26 = vld [vmem:[#allocation2 + $0x178] sm:$0xff] }
  0x17   :  { %341 = vmatpush.msra.mxu0 %v320_v63  ;;  %v826_v27 = vld [vmem:[%s1004_s2 + $0x9] ss:$0 sm:$0xff]  ;;  %v422_v34 = vld [vmem:[#allocation2 + $0x160] sm:$0xff]  ;;  %v460_v35 = vld [vmem:[#allocation2 + $0x198] sm:$0xff] }
  0x18   :  { %274 = vmatpush.msrb.mxu2 %v247_v53  ;;  %308 = vmatpush.msrb.mxu3 %v283_v61  ;;  %v423_v33 = vld [vmem:[#allocation2 + $0x168] sm:$0xff]  ;;  %v457_v43 = vld [vmem:[#allocation2 + $0x180] sm:$0xff]  ;;  %v495_v44 = vld [vmem:[#allocation2 + $0x1b8] sm:$0xff] }
  0x19   :  { %342 = vmatpush.msra.mxu0 %v319_v5  ;;  %v827_v36 = vld [vmem:[%s1004_s2 + $0xa] ss:$0 sm:$0xff]  ;;  %v828_v45 = vld [vmem:[%s1004_s2 + $0xb] ss:$0 sm:$0xff]  ;;  %v492_v52 = vld [vmem:[#allocation2 + $0x1a0] sm:$0xff] }
  0x1a   :  { %309 = vmatpush.msrb.mxu3 %v282_v62  ;;  %v458_v42 = vld [vmem:[#allocation2 + $0x188] sm:$0xff]  ;;  %v530_v53 = vld [vmem:[#allocation2 + $0x1d8] sm:$0xff]  ;;  %v527_v61 = vld [vmem:[#allocation2 + $0x1c0] sm:$0xff] }
  0x1b   :  { %343 = vmatpush.msra.mxu0 %v318_v6  ;;  %v493_v51 = vld [vmem:[#allocation2 + $0x1a8] sm:$0xff]  ;;  %v565_v62 = vld [vmem:[#allocation2 + $0x1f8] sm:$0xff]  ;;  %v562_v6 = vld [vmem:[#allocation2 + $0x1e0] sm:$0xff] }
  0x1c   :  { %v829_v54 = vld [vmem:[%s1004_s2 + $0xc] ss:$0 sm:$0xff]  ;;  %v830_v63 = vld [vmem:[%s1004_s2 + $0xd] ss:$0 sm:$0xff] }
  0x1d   :  { %344 = vmatpush.msra.mxu0 %v317_v7  ;;  %v528_v60 = vld [vmem:[#allocation2 + $0x1c8] sm:$0xff]  ;;  %v600_v7 = vld [vmem:[#allocation2 + $0x218] sm:$0xff] }
  0x1e   :  { %v563_v5 = vld [vmem:[#allocation2 + $0x1e8] sm:$0xff] }
  0x8a   :  { %v66_v10 = vpop.f32.mrf.mxu0 }
  0x8b   :  { %v67_v11 = vadd.f32 %v817_v9, %v66_v10  ;;  %v824_v9 = vld [vmem:[%s1004_s2 + $0x7] ss:$0 sm:$0xff] }
  0x8d   :  { %v69_v12 = vmul.f32 0.01, %v67_v11 }
  0x8f   :  { %v70_v13 = vmax.f32 %v67_v11, %v69_v12 }
  0x91   :  { %776 = vmatmul.msk.f32.vlgmr.msra.gmra.mxu1 %vm45_vm0, %v70_v13 }
  0x92   :  { %376 = vmatpush.msra.mxu1 %v355_v8  ;;  %v831_v8 = vld [vmem:[%s1004_s2 + $0xe] ss:$0 sm:$0xff] }
  0x94   :  { %377 = vmatpush.msra.mxu1 %v354_v14  ;;  %v598_v14 = vld [vmem:[#allocation2 + $0x208] sm:$0xff] }
  0x96   :  { %378 = vmatpush.msra.mxu1 %v353_v15  ;;  %v597_v15 = vld [vmem:[#allocation2 + $0x200] sm:$0xff] }
  0x98   :  { %379 = vmatpush.msra.mxu1 %v352_v16  ;;  %v635_v16 = vld [vmem:[#allocation2 + $0x238] sm:$0xff] }
 0x10e   :  { %v101_v19 = vpop.f32.mrf.mxu1 }
 0x10f   :  { %v102_v20 = vadd.f32 %v818_v18, %v101_v19  ;;  %v825_v18 = vld [vmem:[%s1004_s2 + $0x8] ss:$0 sm:$0xff] }
 0x111   :  { %v104_v21 = vmul.f32 0.01, %v102_v20 }
 0x113   :  { %v105_v22 = vmax.f32 %v102_v20, %v104_v21 }
 0x115   :  { %778 = vmatmul.msk.f32.vlgmr.msra.gmra.mxu2 %vm45_vm0, %v105_v22 }
 0x116   :  { %411 = vmatpush.msra.mxu2 %v390_v17  ;;  %v832_v17 = vld [vmem:[%s1004_s2 + $0xf] ss:$0 sm:$0xff] }
 0x118   :  { %412 = vmatpush.msra.mxu2 %v389_v23  ;;  %v633_v23 = vld [vmem:[#allocation2 + $0x228] sm:$0xff] }
 0x11a   :  { %413 = vmatpush.msra.mxu2 %v388_v24  ;;  %v632_v24 = vld [vmem:[#allocation2 + $0x220] sm:$0xff] }
 0x11c   :  { %414 = vmatpush.msra.mxu2 %v387_v25  ;;  %v670_v25 = vld [vmem:[#allocation2 + $0x258] sm:$0xff] }
 0x198   :  { %v136_v29 = vpop.f32.mrf.mxu2 }
 0x199   :  { %v137_v30 = vadd.f32 %v819_v28, %v136_v29 }
 0x19b   :  { %v139_v31 = vmul.f32 0.01, %v137_v30 }
 0x19d   :  { %v140_v32 = vmax.f32 %v137_v30, %v139_v31 }
 0x19f   :  { %780 = vmatmul.msk.f32.vlgmr.msra.gmra.mxu3 %vm45_vm0, %v140_v32  ;;  %v424_v32 = vld [vmem:[#allocation2 + $0x170] sm:$0xff] }
 0x1a0   :  { %446 = vmatpush.msra.mxu3 %v425_v26  ;;  %v833_v26 = vld [vmem:[%s1004_s2 + $0x10] ss:$0 sm:$0xff] }
 0x1a2   :  { %447 = vmatpush.msra.mxu3 %v424_v32  ;;  %v668_v32 = vld [vmem:[#allocation2 + $0x248] sm:$0xff] }
 0x1a4   :  { %448 = vmatpush.msra.mxu3 %v423_v33  ;;  %v667_v33 = vld [vmem:[#allocation2 + $0x240] sm:$0xff] }
 0x1a6   :  { %449 = vmatpush.msra.mxu3 %v422_v34  ;;  %v705_v34 = vld [vmem:[#allocation2 + $0x278] sm:$0xff] }
 0x222   :  { %v171_v38 = vpop.f32.mrf.mxu3 }
 0x223   :  { %v172_v39 = vadd.f32 %v820_v37, %v171_v38 }
 0x225   :  { %v174_v40 = vmul.f32 0.01, %v172_v39 }
 0x227   :  { %v175_v41 = vmax.f32 %v172_v39, %v174_v40 }
 0x229   :  { %782 = vmatmul.msk.f32.vlgmr.msrb.gmra.mxu0 %vm45_vm0, %v175_v41  ;;  %v459_v41 = vld [vmem:[#allocation2 + $0x190] sm:$0xff] }
 0x22a   :  { %481 = vmatpush.msrb.mxu0 %v460_v35  ;;  %v834_v35 = vld [vmem:[%s1004_s2 + $0x11] ss:$0 sm:$0xff] }
 0x22c   :  { %482 = vmatpush.msrb.mxu0 %v459_v41  ;;  %v703_v41 = vld [vmem:[#allocation2 + $0x268] sm:$0xff] }
 0x22e   :  { %483 = vmatpush.msrb.mxu0 %v458_v42  ;;  %v702_v42 = vld [vmem:[#allocation2 + $0x260] sm:$0xff] }
 0x230   :  { %484 = vmatpush.msrb.mxu0 %v457_v43  ;;  %v739_v43 = vld [vmem:[%s1005_s3 + $0x18] sm:$0xff] }
 0x2a6   :  { %v206_v47 = vpop.f32.mrf.mxu0 }
 0x2a7   :  { %v207_v48 = vadd.f32 %v821_v46, %v206_v47 }
 0x2a9   :  { %v209_v49 = vmul.f32 0.01, %v207_v48 }
 0x2ab   :  { %v210_v50 = vmax.f32 %v207_v48, %v209_v49 }
 0x2ad   :  { %784 = vmatmul.msk.f32.vlgmr.msrb.gmra.mxu1 %vm45_vm0, %v210_v50  ;;  %v494_v50 = vld [vmem:[#allocation2 + $0x1b0] sm:$0xff] }
 0x2ae   :  { %516 = vmatpush.msrb.mxu1 %v495_v44  ;;  %v835_v44 = vld [vmem:[%s1004_s2 + $0x12] ss:$0 sm:$0xff] }
 0x2b0   :  { %517 = vmatpush.msrb.mxu1 %v494_v50  ;;  %v737_v50 = vld [vmem:[%s1005_s3 + $0x8] sm:$0xff] }
 0x2b2   :  { %518 = vmatpush.msrb.mxu1 %v493_v51  ;;  %v736_v51 = vld [vmem:[%s1005_s3] sm:$0xff] }
 0x2b4   :  { %519 = vmatpush.msrb.mxu1 %v492_v52  ;;  %v836_v52 = vld [vmem:[%s1004_s2 + $0x13] ss:$0 sm:$0xff] }
 0x32a   :  { %v241_v56 = vpop.f32.mrf.mxu1 }
 0x32b   :  { %v242_v57 = vadd.f32 %v822_v55, %v241_v56 }
 0x32d   :  { %v244_v58 = vmul.f32 0.01, %v242_v57 }
 0x32f   :  { %v245_v59 = vmax.f32 %v242_v57, %v244_v58 }
 0x331   :  { %786 = vmatmul.msk.f32.vlgmr.msrb.gmra.mxu2 %vm45_vm0, %v245_v59  ;;  %v529_v59 = vld [vmem:[#allocation2 + $0x1d0] sm:$0xff] }
 0x332   :  { %551 = vmatpush.msrb.mxu2 %v530_v53 }
 0x334   :  { %552 = vmatpush.msrb.mxu2 %v529_v59 }
 0x336   :  { %553 = vmatpush.msrb.mxu2 %v528_v60 }
 0x338   :  { %554 = vmatpush.msrb.mxu2 %v527_v61 }
 0x3b4   :  { %v276_v1 = vpop.f32.mrf.mxu2 }
 0x3b5   :  { %v277_v2 = vadd.f32 %v823_v0, %v276_v1 }
 0x3b7   :  { %v279_v3 = vmul.f32 0.01, %v277_v2 }
 0x3b9   :  { %v280_v4 = vmax.f32 %v277_v2, %v279_v3 }
 0x3bb   :  { %788 = vmatmul.msk.f32.vlgmr.msrb.gmra.mxu3 %vm45_vm0, %v280_v4  ;;  %v564_v4 = vld [vmem:[#allocation2 + $0x1f0] sm:$0xff] }
 0x3bc   :  { %586 = vmatpush.msrb.mxu3 %v565_v62 }
 0x3be   :  { %587 = vmatpush.msrb.mxu3 %v564_v4 }
 0x3c0   :  { %588 = vmatpush.msrb.mxu3 %v563_v5 }
 0x3c2   :  { %589 = vmatpush.msrb.mxu3 %v562_v6 }
 0x43e   :  { %v311_v10 = vpop.f32.mrf.mxu3 }
 0x43f   :  { %v312_v11 = vadd.f32 %v824_v9, %v311_v10 }
 0x441   :  { %v314_v12 = vmul.f32 0.01, %v312_v11 }
 0x443   :  { %v315_v13 = vmax.f32 %v312_v11, %v314_v12 }
 0x445   :  { %790 = vmatmul.msk.f32.vlgmr.msra.gmra.mxu0 %vm45_vm0, %v315_v13  ;;  %v599_v13 = vld [vmem:[#allocation2 + $0x210] sm:$0xff] }
 0x446   :  { %621 = vmatpush.msra.mxu0 %v600_v7 }
 0x448   :  { %622 = vmatpush.msra.mxu0 %v599_v13 }
 0x44a   :  { %623 = vmatpush.msra.mxu0 %v598_v14 }
 0x44c   :  { %624 = vmatpush.msra.mxu0 %v597_v15 }
 0x4c2   :  { %v346_v19 = vpop.f32.mrf.mxu0 }
 0x4c3   :  { %v347_v20 = vadd.f32 %v825_v18, %v346_v19 }
 0x4c5   :  { %v349_v21 = vmul.f32 0.01, %v347_v20 }
 0x4c7   :  { %v350_v22 = vmax.f32 %v347_v20, %v349_v21 }
 0x4c9   :  { %792 = vmatmul.msk.f32.vlgmr.msra.gmra.mxu1 %vm45_vm0, %v350_v22  ;;  %v634_v22 = vld [vmem:[#allocation2 + $0x230] sm:$0xff] }
 0x4ca   :  { %656 = vmatpush.msra.mxu1 %v635_v16 }
 0x4cc   :  { %657 = vmatpush.msra.mxu1 %v634_v22 }
 0x4ce   :  { %658 = vmatpush.msra.mxu1 %v633_v23 }
 0x4d0   :  { %659 = vmatpush.msra.mxu1 %v632_v24 }
 0x546   :  { %v381_v28 = vpop.f32.mrf.mxu1 }
 0x547   :  { %v382_v29 = vadd.f32 %v826_v27, %v381_v28 }
 0x549   :  { %v384_v30 = vmul.f32 0.01, %v382_v29 }
 0x54b   :  { %v385_v31 = vmax.f32 %v382_v29, %v384_v30 }
 0x54d   :  { %794 = vmatmul.msk.f32.vlgmr.msra.gmra.mxu2 %vm45_vm0, %v385_v31  ;;  %v669_v31 = vld [vmem:[#allocation2 + $0x250] sm:$0xff] }
 0x54e   :  { %691 = vmatpush.msra.mxu2 %v670_v25 }
 0x550   :  { %692 = vmatpush.msra.mxu2 %v669_v31 }
 0x552   :  { %693 = vmatpush.msra.mxu2 %v668_v32 }
 0x554   :  { %694 = vmatpush.msra.mxu2 %v667_v33 }
 0x5d0   :  { %v416_v37 = vpop.f32.mrf.mxu2 }
 0x5d1   :  { %v417_v38 = vadd.f32 %v827_v36, %v416_v37 }
 0x5d3   :  { %v419_v39 = vmul.f32 0.01, %v417_v38 }
 0x5d5   :  { %v420_v40 = vmax.f32 %v417_v38, %v419_v39 }
 0x5d7   :  { %796 = vmatmul.msk.f32.vlgmr.msra.gmra.mxu3 %vm45_vm0, %v420_v40  ;;  %v704_v40 = vld [vmem:[#allocation2 + $0x270] sm:$0xff] }
 0x5d8   :  { %726 = vmatpush.msra.mxu3 %v705_v34 }
 0x5da   :  { %727 = vmatpush.msra.mxu3 %v704_v40 }
 0x5dc   :  { %728 = vmatpush.msra.mxu3 %v703_v41 }
 0x5de   :  { %729 = vmatpush.msra.mxu3 %v702_v42 }
 0x65a   :  { %v451_v46 = vpop.f32.mrf.mxu3 }
 0x65b   :  { %v452_v47 = vadd.f32 %v828_v45, %v451_v46 }
 0x65d   :  { %v454_v48 = vmul.f32 0.01, %v452_v47 }
 0x65f   :  { %v455_v49 = vmax.f32 %v452_v47, %v454_v48 }
 0x661   :  { %798 = vmatmul.msk.f32.vlgmr.msrb.gmra.mxu0 %vm45_vm0, %v455_v49  ;;  %v738_v49 = vld [vmem:[%s1005_s3 + $0x10] sm:$0xff] }
 0x662   :  { %759 = vmatpush.msrb.mxu0 %v739_v43 }
 0x664   :  { %760 = vmatpush.msrb.mxu0 %v738_v49 }
 0x666   :  { %761 = vmatpush.msrb.mxu0 %v737_v50 }
 0x668   :  { %762 = vmatpush.msrb.mxu0 %v736_v51 }
 0x6de   :  { %v486_v55 = vpop.f32.mrf.mxu0 }
 0x6df   :  { %v487_v56 = vadd.f32 %v829_v54, %v486_v55 }
 0x6e1   :  { %v489_v57 = vmul.f32 0.01, %v487_v56 }
 0x6e3   :  { %v490_v58 = vmax.f32 %v487_v56, %v489_v57  ;;  %v837_v57 = vld [vmem:[%s1006_s4] ss:$0 sm:$0xff] }
 0x6e5   :  { %800 = vmatmul.msk.f32.vlgmr.msrb.gmra.mxu1 %vm45_vm0, %v490_v58 }
 0x762   :  { %v521_v0 = vpop.f32.mrf.mxu1 }
 0x763   :  { %v522_v1 = vadd.f32 %v830_v63, %v521_v0 }
 0x765   :  { %v524_v2 = vmul.f32 0.01, %v522_v1 }
 0x767   :  { %v525_v3 = vmax.f32 %v522_v1, %v524_v2 }
 0x769   :  { %802 = vmatmul.msk.f32.vlgmr.msrb.gmra.mxu2 %vm45_vm0, %v525_v3 }
 0x7ec   :  { %v556_v9 = vpop.f32.mrf.mxu2 }
 0x7ed   :  { %v557_v10 = vadd.f32 %v831_v8, %v556_v9 }
 0x7ef   :  { %v559_v11 = vmul.f32 0.01, %v557_v10 }
 0x7f1   :  { %v560_v12 = vmax.f32 %v557_v10, %v559_v11 }
 0x7f3   :  { %804 = vmatmul.msk.f32.vlgmr.msrb.gmra.mxu3 %vm45_vm0, %v560_v12 }
 0x876   :  { %v591_v18 = vpop.f32.mrf.mxu3 }
 0x877   :  { %v592_v19 = vadd.f32 %v832_v17, %v591_v18 }
 0x879   :  { %v594_v20 = vmul.f32 0.01, %v592_v19 }
 0x87b   :  { %v595_v21 = vmax.f32 %v592_v19, %v594_v20 }
 0x87d   :  { %806 = vmatmul.msk.f32.vlgmr.msra.gmra.mxu0 %vm45_vm0, %v595_v21 }
 0x8fa   :  { %v626_v27 = vpop.f32.mrf.mxu0 }
 0x8fb   :  { %v627_v28 = vadd.f32 %v833_v26, %v626_v27 }
 0x8fd   :  { %v629_v29 = vmul.f32 0.01, %v627_v28 }
 0x8ff   :  { %v630_v30 = vmax.f32 %v627_v28, %v629_v29 }
 0x901   :  { %808 = vmatmul.msk.f32.vlgmr.msra.gmra.mxu1 %vm45_vm0, %v630_v30 }
 0x97e   :  { %v661_v36 = vpop.f32.mrf.mxu1 }
 0x97f   :  { %v662_v37 = vadd.f32 %v834_v35, %v661_v36 }
 0x981   :  { %v664_v38 = vmul.f32 0.01, %v662_v37 }
 0x983   :  { %v665_v39 = vmax.f32 %v662_v37, %v664_v38 }
 0x985   :  { %810 = vmatmul.msk.f32.vlgmr.msra.gmra.mxu2 %vm45_vm0, %v665_v39 }
 0xa08   :  { %v696_v45 = vpop.f32.mrf.mxu2 }
 0xa09   :  { %v697_v46 = vadd.f32 %v835_v44, %v696_v45 }
 0xa0b   :  { %v699_v47 = vmul.f32 0.01, %v697_v46 }
 0xa0d   :  { %v700_v48 = vmax.f32 %v697_v46, %v699_v47 }
 0xa0f   :  { %812 = vmatmul.msk.f32.vlgmr.msra.gmra.mxu3 %vm45_vm0, %v700_v48 }
 0xa92   :  { %v731_v53 = vpop.f32.mrf.mxu3 }
 0xa93   :  { %v732_v54 = vadd.f32 %v836_v52, %v731_v53 }
 0xa95   :  { %v734_v55 = vmul.f32 0.01, %v732_v54 }
 0xa97   :  { %v735_v56 = vmax.f32 %v732_v54, %v734_v55 }
 0xa99   :  { %813 = vmatmul.msk.f32.vlgmr.msrb.gmra.mxu0 %vm45_vm0, %v735_v56 }
 0xb16   :  { %v764_v58 = vpop.f32.mrf.mxu0 }
 0xb17   :  { %v765_v59 = vadd.f32 %v837_v57, %v764_v58 }
 0xb19   :  { %768 = vst.msk [vmem:[%s1007_s5] sm:$0xff] %vm767_vm1, %v765_v59 }
 0xb1a   :  { %773 = vsyncpa [#allocation3], 1 }

</bundles_post_ra>
